<compile_context>
chip_gen: v6e
topology: v6e:2x2x1
jax: 0.10.0
libtpu: 0.0.40
codegen_flags: <defaults>
</compile_context>

<pallas_src>
import jax
import jax.numpy as jnp
from jax.experimental import pallas as pl
from jax.experimental.pallas import tpu as pltpu

VERY_NEGATIVE_NUMBER = -1e30

_TARGET_X_TILE_BYTES = 8 * 1024 * 1024    # per-grid-step x traffic target (all heads)
_VMEM_CAP_BYTES = 48 * 1024 * 1024        # stays safely under v7x's 64 MiB physical VMEM


def _project_and_mask(x, w, m):
    """x: (bn, C, lt) activations (NCL: L on lanes, C on sublanes),
    w: (C, 1) 1x1-conv weight column, m: (bn, lt) mask. All f32.
    1x1 conv over channels == VPU broadcast-multiply + sublane reduce (XLU)."""
    logits = jnp.sum(x * w[None, :, :], axis=1)               # (bn, lt)
    return logits * m + (1.0 - m) * VERY_NEGATIVE_NUMBER


def pointer_net_kernel(x_ref, w_ref, mask_ref, out_ref):
    x = x_ref[...].astype(jnp.float32)
    w = w_ref[...].astype(jnp.float32)
    m = mask_ref[...].astype(jnp.float32)
    out_ref[...] = _project_and_mask(x, w, m)


def dual_pointer_net_kernel(x1_ref, x2_ref, w1_ref, w2_ref, mask_ref,
                            out1_ref, out2_ref):
    # Start + end pointer heads in a single launch (they share mask_C in QANet).
    m = mask_ref[...].astype(jnp.float32)
    out1_ref[...] = _project_and_mask(x1_ref[...].astype(jnp.float32),
                                      w1_ref[...].astype(jnp.float32), m)
    out2_ref[...] = _project_and_mask(x2_ref[...].astype(jnp.float32),
                                      w2_ref[...].astype(jnp.float32), m)


def _pick_tiles(n, c, l, itemsize, n_heads):
    """Auto-derive (batch_tile, seq_tile).  Batch tile is a multiple of 8 (sublane
    alignment of the (bn, lt) mask/output blocks) unless it covers the full batch;
    the L tile is a multiple of 128 that divides L (lane-dense, unmasked stores)."""
    target = max(_TARGET_X_TILE_BYTES // n_heads, 128 * 1024)

    # Sequence tile.
    lt = l
    if l > 128 and l % 128 == 0:
        divisors = [t for t in range(128, l + 1, 128) if l % t == 0]
        fitting = [t for t in divisors if 8 * c * t * itemsize <= target]
        lt = max(fitting) if fitting else min(divisors)

    # Batch tile.
    if n <= 8:
        bn = n
    else:
        row_bytes = c * lt * itemsize
        bn = max(8, min((target // row_bytes) // 8 * 8, ((n + 7) // 8) * 8))
        # Guarantee >= 2 grid steps when possible so v7x's 2 TensorCores share work.
        while bn > 8 and pl.cdiv(n, bn) * pl.cdiv(l, lt) < 2:
            bn -= 8
    return bn, lt


def _vmem_limit(bn, c, lt, in_itemsize, n_heads):
    # Double-buffered x tiles + mask + f32 output tiles, with 2x headroom.
    ws = (n_heads * 2 * bn * c * lt * in_itemsize     # x tiles (double-buffered)
          + 2 * bn * lt * in_itemsize                 # mask tile
          + n_heads * 2 * bn * lt * 4                 # f32 output tiles
          + 4 * c * 4)                                # weight columns
    return int(min(_VMEM_CAP_BYTES, max(32 * 1024 * 1024, 2 * ws)))


def pointer_net_forward(x_ncl, weight, mask):
    """x_ncl: (N, C, L) activations (native PyTorch NCL layout, f32 or bf16),
    weight: (1, C, 1) Conv1d weight, mask: (N, L).  Returns masked logits (N, L) f32."""
    n, c, l = x_ncl.shape
    w = weight.reshape(c, 1).astype(jnp.float32)

    itemsize = jnp.dtype(x_ncl.dtype).itemsize
    bn, lt = _pick_tiles(n, c, l, itemsize, n_heads=1)
    grid = (pl.cdiv(n, bn), pl.cdiv(l, lt))

    return pl.pallas_call(
        pointer_net_kernel,
        out_shape=jax.ShapeDtypeStruct((n, l), jnp.float32),
        grid=grid,
        in_specs=[
            pl.BlockSpec((bn, c, lt), lambda i, j: (i, 0, j)),
            pl.BlockSpec((c, 1), lambda i, j: (0, 0)),
            pl.BlockSpec((bn, lt), lambda i, j: (i, j)),
        ],
        out_specs=pl.BlockSpec((bn, lt), lambda i, j: (i, j)),
        compiler_params=pltpu.CompilerParams(
            dimension_semantics=("parallel", "parallel"),
            vmem_limit_bytes=_vmem_limit(bn, c, lt, itemsize, n_heads=1)),
    )(x_ncl, w, mask)


def dual_pointer_net_forward(x1_ncl, x2_ncl, w1, w2, mask):
    """Fused start/end pointer heads: one pallas_call, two projections, shared
    mask (as in QANet, where both heads use mask_C).  Returns (logits1, logits2)."""
    n, c, l = x1_ncl.shape
    w1m = w1.reshape(c, 1).astype(jnp.float32)
    w2m = w2.reshape(c, 1).astype(jnp.float32)

    itemsize = max(jnp.dtype(x1_ncl.dtype).itemsize, jnp.dtype(x2_ncl.dtype).itemsize)
    bn, lt = _pick_tiles(n, c, l, itemsize, n_heads=2)
    grid = (pl.cdiv(n, bn), pl.cdiv(l, lt))

    x_spec = pl.BlockSpec((bn, c, lt), lambda i, j: (i, 0, j))
    w_spec = pl.BlockSpec((c, 1), lambda i, j: (0, 0))
    nl_spec = pl.BlockSpec((bn, lt), lambda i, j: (i, j))

    return pl.pallas_call(
        dual_pointer_net_kernel,
        out_shape=(jax.ShapeDtypeStruct((n, l), jnp.float32),
                   jax.ShapeDtypeStruct((n, l), jnp.float32)),
        grid=grid,
        in_specs=[x_spec, x_spec, w_spec, w_spec, nl_spec],
        out_specs=[nl_spec, nl_spec],
        compiler_params=pltpu.CompilerParams(
            dimension_semantics=("parallel", "parallel"),
            vmem_limit_bytes=_vmem_limit(bn, c, lt, itemsize, n_heads=2)),
    )(x1_ncl, x2_ncl, w1m, w2m, mask)


def reference_forward(x_ncl, weight, mask):
    # Pure-JAX reference of the PyTorch forward (conv1x1 + squeeze + apply_mask).
    x = x_ncl.astype(jnp.float32)
    w = weight.reshape(-1).astype(jnp.float32)
    m = mask.astype(jnp.float32)
    logits = jnp.einsum("ncl,c->nl", x, w)
    return logits * m + (1.0 - m) * VERY_NEGATIVE_NUMBER


# TODO(synk): the rest of QANet (embeddings, encoder blocks, context-query
# attention) is not kernelized here; only the PointerNet head is implemented.

if __name__ == "__main__":
    key = jax.random.PRNGKey(0)
    k_x1, k_x2, k_w1, k_w2 = jax.random.split(key, 4)

    # --- small config matching the module head (in_features = 2*d_model) ---
    N, C, L = 2, 8, 128
    x1 = jax.random.normal(k_x1, (N, C, L), dtype=jnp.float32)
    x2 = jax.random.normal(k_x2, (N, C, L), dtype=jnp.float32)

    bound = 1.0 / jnp.sqrt(jnp.float32(C))
    w1 = jax.random.uniform(k_w1, (1, C, 1), dtype=jnp.float32,
                            minval=-bound, maxval=bound)
    w2 = jax.random.uniform(k_w2, (1, C, 1), dtype=jnp.float32,
                            minval=-bound, maxval=bound)

    lengths = jnp.array([L, L // 2], dtype=jnp.int32)
    mask = (jnp.arange(L)[None, :] < lengths[:, None]).astype(jnp.float32)

    out1 = jax.block_until_ready(pointer_net_forward(x1, w1, mask))
    ref1 = reference_forward(x1, w1, mask)
    assert out1.shape == (N, L)
    assert jnp.allclose(out1, ref1, rtol=1e-5, atol=1e-5), "single-head mismatch"

    d1, d2 = jax.block_until_ready(dual_pointer_net_forward(x1, x2, w1, w2, mask))
    ref2 = reference_forward(x2, w2, mask)
    assert jnp.allclose(d1, ref1, rtol=1e-5, atol=1e-5), "dual-head start mismatch"
    assert jnp.allclose(d2, ref2, rtol=1e-5, atol=1e-5), "dual-head end mismatch"

    # --- slightly larger config to exercise the tiled (multi-step) grid path
    #     and the bf16-input path -------------------------------------------
    N2, C2, L2 = 16, 8, 256
    kb1, kb2, kbw = jax.random.split(jax.random.PRNGKey(1), 3)
    xb = jax.random.normal(kb1, (N2, C2, L2), dtype=jnp.float32).astype(jnp.bfloat16)
    wb = jax.random.uniform(kbw, (1, C2, 1), dtype=jnp.float32,
                            minval=-0.3, maxval=0.3)
    lens2 = (jax.random.randint(kb2, (N2,), 1, L2 + 1)).astype(jnp.int32)
    mask2 = (jnp.arange(L2)[None, :] < lens2[:, None]).astype(jnp.float32)

    outb = jax.block_until_ready(pointer_net_forward(xb, wb, mask2))
    refb = reference_forward(xb, wb, mask2)
    assert jnp.allclose(outb, refb, rtol=1e-5, atol=1e-4), "tiled/bf16 mismatch"

    print("KERNEL_OK")
</pallas_src>

<mosaic_0001>
module attributes {stable_mosaic.version = 11 : i64} {
  func.func @pointer_net_kernel(%arg0: i32, %arg1: i32, %arg2: memref<2x8x128xf32, #tpu.memory_space<vmem>>, %arg3: memref<8x1xf32, #tpu.memory_space<vmem>>, %arg4: memref<2x128xf32, #tpu.memory_space<vmem>>, %arg5: memref<2x128xf32, #tpu.memory_space<vmem>>) attributes {dimension_semantics = [#tpu.dimension_semantics<parallel>, #tpu.dimension_semantics<parallel>], iteration_bounds = array<i64: 1, 1>, scalar_prefetch = 0 : i64, scratch_operands = 0 : i64, tpu.core_type = #tpu.core_type<tc>, window_params = [{transform_indices = @transform_0, window_bounds = array<i64: 2, 8, 128>}, {pipeline_mode = #tpu.pipeline_mode<synchronous>, transform_indices = @transform_1, window_bounds = array<i64: 8, 1>}, {transform_indices = @transform_2, window_bounds = array<i64: 2, 128>}, {transform_indices = @transform_3, window_bounds = array<i64: 2, 128>}]} {
    %c0 = arith.constant 0 : index
    %c0_0 = arith.constant 0 : index
    %c0_1 = arith.constant 0 : index
    %0 = vector.load %arg2[%c0, %c0_0, %c0_1] : memref<2x8x128xf32, #tpu.memory_space<vmem>>, vector<2x8x128xf32>
    %c0_2 = arith.constant 0 : index
    %c0_3 = arith.constant 0 : index
    %1 = vector.load %arg3[%c0_2, %c0_3] : memref<8x1xf32, #tpu.memory_space<vmem>>, vector<8x1xf32>
    %c0_4 = arith.constant 0 : index
    %c0_5 = arith.constant 0 : index
    %2 = vector.load %arg4[%c0_4, %c0_5] : memref<2x128xf32, #tpu.memory_space<vmem>>, vector<2x128xf32>
    %3 = vector.shape_cast %1 : vector<8x1xf32> to vector<1x8x1xf32>
    %4 = vector.broadcast %3 : vector<1x8x1xf32> to vector<2x8x128xf32>
    %5 = arith.mulf %0, %4 : vector<2x8x128xf32>
    %cst = arith.constant dense<0.000000e+00> : vector<2x128xf32>
    %6 = vector.multi_reduction <add>, %5, %cst [1] : vector<2x8x128xf32> to vector<2x128xf32>
    %7 = arith.mulf %6, %2 : vector<2x128xf32>
    %cst_6 = arith.constant 1.000000e+00 : f32
    %8 = vector.broadcast %cst_6 : f32 to vector<2x128xf32>
    %9 = arith.subf %8, %2 : vector<2x128xf32>
    %cst_7 = arith.constant -1.000000e+30 : f32
    %10 = vector.broadcast %cst_7 : f32 to vector<2x128xf32>
    %11 = arith.mulf %9, %10 : vector<2x128xf32>
    %12 = arith.addf %7, %11 : vector<2x128xf32>
    %c0_8 = arith.constant 0 : index
    %c0_9 = arith.constant 0 : index
    %13 = vector.load %arg5[%c0_8, %c0_9] : memref<2x128xf32, #tpu.memory_space<vmem>>, vector<2x128xf32>
    tpu.vector_store %arg5[%c0_8, %c0_9], %12 {strides = array<i32>} : memref<2x128xf32, #tpu.memory_space<vmem>>, vector<2x128xf32>,
    return
  }
  func.func @transform_0(%arg0: i32, %arg1: i32) -> (i32, i32, i32) {
    %c0_i32 = arith.constant 0 : i32
    %c0_i32_0 = arith.constant 0 : i32
    return %arg0, %c0_i32, %arg1 : i32, i32, i32
  }
  func.func @transform_1(%arg0: i32, %arg1: i32) -> (i32, i32) {
    %c0_i32 = arith.constant 0 : i32
    %c0_i32_0 = arith.constant 0 : i32
    %c0_i32_1 = arith.constant 0 : i32
    return %c0_i32, %c0_i32_0 : i32, i32
  }
  func.func @transform_2(%arg0: i32, %arg1: i32) -> (i32, i32) {
    %c0_i32 = arith.constant 0 : i32
    return %arg0, %arg1 : i32, i32
  }
  func.func @transform_3(%arg0: i32, %arg1: i32) -> (i32, i32) {
    %c0_i32 = arith.constant 0 : i32
    return %arg0, %arg1 : i32, i32
  }
}

</mosaic_0001>

<bundles_post_ra>
// kernel: tpu_custom_call.1
= control target key start
LH: loop header
LB: loop body
LE: loop exit
PB: predicated region body
PF: predicated region fallthrough
CT: control target
= control target key end

     0   :  { %8 = vsyncpa [#allocation3], 0  ;;  %s175_s0 = inlined_call_operand.hbm [shape: f32[2,8,128], index: 0, kind: input, shape index: {}]   ;;  %s176_s1 = inlined_call_operand.vmem [shape: f32[8,1], index: 1, kind: input, shape index: {}]   ;;  %s177_s2 = inlined_call_operand.vmem [shape: f32[2,128], index: 2, kind: input, shape index: {}]   ;;  %s178_s3 = inlined_call_operand.hbm [shape: f32[2,128], index: 3, kind: output, shape index: {}]  }
   0x1   :  { %9 = vsyncpa [#allocation4], 0  ;;  %s138_s12 = smov [#allocation2]  }
   0x2   :  { %s15_s13 = sshll.u32 %s138_s12, 4  ;;  %s16_s13 = int_to_ptr.vmem [resolvable:$true] %s15_s13 }
   0x3   :  { %s102_s14 = scalar_lea.vmem %s16_s13, 256  ;;  %p107_p1 = scmp.lt.s32.totalorder %s16_s13, %s16_s13 }
   0x4   :  { %p103_p0 = scmp.ne.s32.totalorder %s16_s13, %s102_s14  ;;  %p108_p2 = scmp.lt.s32.totalorder %s102_s14, %s102_s14 }
   0x6   :  { %p109_p3 = por %p108_p2, %p107_p1 }
   0x8   :  { %p110_p4 = pnand %p109_p3, %p103_p0 }
   0xa   :  { %113 = shalt.err (!%p110_p4)
}
   0xb   :  { %s139_s15 = smov 128   ;;  %s140_s16 = smov 8  }
   0xc   :  { %21 = dma.hbm_to_vmem [thread:$0]  %s175_s0, 256, %s16_s13, [#allocation3], %s139_s15, %s139_s15, %s140_s16  }
   0xd   :  { %134 = dma.done.wait [#allocation3], 256  }
   0xe   :  { %135 = vsyncadd [#allocation3], 4294967040  ;;  %v141_v0 = vmov 0   ;;  %v31_v1 = vld [vmem:[%s176_s1] sm:$0xff]  ;;  %v30_v3 = vld [vmem:[#allocation2 + $0x8] sm:$0xff]  ;;  %s142_s0 = smov [#allocation5]  }
   0xf   :  { %93 = vset.pattern.permute.xlu0 %v141_v0  ;;  %v29_v2 = vld [vmem:[#allocation2] sm:$0xff]  ;;  %s79_s1 = sshll.u32 %s142_s0, 4  ;;  %vm69_vm0 = vcmask 1041409   ;;  %s80_s1 = int_to_ptr.vmem [resolvable:$true] %s79_s1 }
  0x10   :  { %35 = vperm.xlu0 %93, %v31_v1   ;;  %v32_v7 = vld [vmem:[%s177_s2] sm:$0x3]  ;;  %s114_s2 = scalar_lea.vmem %s80_s1, 32  ;;  %p119_p6 = scmp.lt.s32.totalorder %s80_s1, %s80_s1 }
  0x11   :  { %v58_v12 = vsub.f32 1.0, %v32_v7  ;;  %v53_v18 = vrot.slane %v32_v7, 1  ;;  %p115_p5 = scmp.ne.s32.totalorder %s80_s1, %s114_s2  ;;  %p120_p7 = scmp.lt.s32.totalorder %s114_s2, %s114_s2 }
  0x13   :  { %v59_v17 = vmul.f32 -1e+30, %v58_v12  ;;  %p121_p8 = por %p120_p7, %p119_p6 }
  0x15   :  { %v61_v23 = vrot.slane %v59_v17, 1  ;;  %p122_p9 = pnand %p121_p8, %p115_p5 }
  0x8b   :  { %v36_v4 = vpop.permute.xlu0 %35 }
  0x8c   :  { %v38_v5 = vmul.f32 %v36_v4, %v29_v2  ;;  %v39_v6 = vmul.f32 %v36_v4, %v30_v3 }
  0x8e   :  { %v40_v8 = vrot.slane %v38_v5, 4  ;;  %v46_v9 = vrot.slane %v39_v6, 4 }
  0x90   :  { %v41_v10 = vadd.f32 %v40_v8, %v38_v5  ;;  %v47_v11 = vadd.f32 %v46_v9, %v39_v6 }
  0x92   :  { %v42_v13 = vrot.slane %v41_v10, 2  ;;  %v48_v14 = vrot.slane %v47_v11, 2 }
  0x94   :  { %v43_v15 = vadd.f32 %v42_v13, %v41_v10  ;;  %v49_v16 = vadd.f32 %v48_v14, %v47_v11 }
  0x96   :  { %v44_v19 = vrot.slane %v43_v15, 1  ;;  %v50_v20 = vrot.slane %v49_v16, 1 }
  0x98   :  { %v45_v21 = vadd.f32 %v44_v19, %v43_v15  ;;  %v51_v22 = vadd.f32 %v50_v20, %v49_v16 }
  0x9a   :  { %v56_v24 = vmul.f32 %v45_v21, %v32_v7  ;;  %v57_v25 = vmul.f32 %v53_v18, %v51_v22 }
  0x9c   :  { %v65_v26 = vadd.f32 %v61_v23, %v57_v25  ;;  %v64_v27 = vadd.f32 %v59_v17, %v56_v24 }
  0x9e   :  { %v68_v28 = vrot.slane %v65_v26, 7 }
  0xa0   :  { %v70_v29 = vsel %vm69_vm0, %v68_v28, %v64_v27 }
  0xa1   :  { %72 = vst [vmem:[#allocation5] sm:$0x3] %v70_v29 }
  0xa2   :  { %125 = shalt.err (!%p122_p9)
}
  0xa3   :  { %82 = dma.vmem_to_hbm [thread:$0]  %s80_s1, 32, %s178_s3, [#allocation4]  }
  0xa4   :  { %136 = dma.done.wait [#allocation4], 32  }
  0xa5   :  { %137 = vsyncadd [#allocation4], 4294967264 }
  0xa6   :  { %86 = vsyncpa [#allocation3], 1 }
  0xa7   :  { %87 = vsyncpa [#allocation4], 1 }

</bundles_post_ra>
